<compile_context>
chip_gen: v7x
topology: tpu7x:2x2x1
jax: 0.10.0
libtpu: 0.0.40
codegen_flags: <defaults>
</compile_context>

<pallas_src>
import functools

import jax
import jax.numpy as jnp
from jax.experimental import pallas as pl
from jax.experimental.pallas import tpu as pltpu


def ffn_kernel(x_ref, w1_ref, b1_ref, w2_ref, b2_ref, o_ref, acc_ref, *,
               activation):
    # x_ref:  (tm, d_model)        bf16/f32
    # w1_ref: (d_model, tk)        b1_ref: (1, tk)      f32
    # w2_ref: (tk, d_model)        b2_ref: (1, d_model) f32
    # o_ref:  (tm, d_model)        acc_ref: (tm, d_model) f32 scratch
    k = pl.program_id(1)

    @pl.when(k == 0)
    def _init():
        acc_ref[...] = jnp.zeros_like(acc_ref)

    # h_k = act(x @ W1[:, chunk k] + b1[chunk k])  -- f32 accumulation on MXU,
    # bias + activation in f32 on VPU/EUP.
    h = jnp.dot(x_ref[...], w1_ref[...], preferred_element_type=jnp.float32)
    h = h + b1_ref[...]
    if activation == "relu":
        h = jnp.maximum(h, 0.0)
    elif activation == "gelu":
        h = jax.nn.gelu(h)              # tanh/exp land on the EUP slot
    elif activation == "lrelu":
        h = jnp.where(h > 0.0, h, 0.01 * h)
    else:
        raise ValueError(f"unsupported activation: {activation}")
    # TODO(synk): dropout omitted (inference mode == identity); training-mode
    # dropout would need pltpu.prng_seed / pltpu.prng_random_bits in-kernel.

    # acc += h_k @ W2[chunk k, :]   (h downcast to weight dtype; acc stays f32)
    acc_ref[...] += jnp.dot(h.astype(w2_ref.dtype), w2_ref[...],
                            preferred_element_type=jnp.float32)

    @pl.when(k == pl.num_programs(1) - 1)
    def _finalize():
        o_ref[...] = (acc_ref[...] + b2_ref[...]).astype(o_ref.dtype)


def _round_up(x, m):
    return (x + m - 1) // m * m


def _pick_tk(d_ff, tk):
    """Largest multiple of 128 that divides d_ff and is <= requested tk."""
    tk = max(128, min(tk, d_ff))
    tk = (tk // 128) * 128
    while d_ff % tk != 0:
        tk -= 128
    return tk


def positionwise_ffn(x, w1, b1, w2, b2, *, activation="relu", tm=256, tk=512):
    """y = act(x @ w1 + b1) @ w2 + b2   (dropout = identity, inference).

    x:  [M, d_model]  (feature dim last / lane-dense; bf16 or f32)
    w1: [d_model, d_ff]   b1: [1, d_ff]
    w2: [d_ff, d_model]   b2: [1, d_model]
    """
    M, d_model = x.shape
    d_ff = w1.shape[1]
    assert d_model % 128 == 0, "pad d_model to a multiple of 128 (lane-dense output)"
    assert d_ff % 128 == 0, "pad d_ff to a multiple of 128"

    # Shrink tiles for small problems (keep sublane/lane alignment).
    tm = min(tm, _round_up(M, 16))
    tk = _pick_tk(d_ff, tk)

    # Pad rows so the M grid divides evenly; padded rows are sliced off at the end.
    M_pad = _round_up(M, tm)
    if M_pad != M:
        x = jnp.pad(x, ((0, M_pad - M), (0, 0)))

    grid = (M_pad // tm, d_ff // tk)  # reduction (d_ff) axis last

    nbytes = lambda a: a.size * a.dtype.itemsize
    cost = pl.CostEstimate(
        flops=4 * M_pad * d_model * d_ff,  # two matmuls
        transcendentals=(M_pad * d_ff if activation == "gelu" else 0),
        bytes_accessed=(nbytes(x) + nbytes(w1) + nbytes(b1) + nbytes(w2)
                        + nbytes(b2) + M_pad * d_model * x.dtype.itemsize),
    )

    kernel = functools.partial(ffn_kernel, activation=activation)

    out = pl.pallas_call(
        kernel,
        out_shape=jax.ShapeDtypeStruct((M_pad, d_model), x.dtype),
        grid_spec=pltpu.PrefetchScalarGridSpec(
            num_scalar_prefetch=0,
            grid=grid,
            in_specs=[
                pl.BlockSpec((tm, d_model), lambda i, k: (i, 0)),   # x tile (resident over k)
                pl.BlockSpec((d_model, tk), lambda i, k: (0, k)),   # W1 chunk (streams over k)
                pl.BlockSpec((1, tk), lambda i, k: (0, k)),         # b1 chunk
                pl.BlockSpec((tk, d_model), lambda i, k: (k, 0)),   # W2 chunk (streams over k)
                pl.BlockSpec((1, d_model), lambda i, k: (0, 0)),    # b2 (tiny, grid-invariant)
            ],
            out_specs=pl.BlockSpec((tm, d_model), lambda i, k: (i, 0)),
            scratch_shapes=[pltpu.VMEM((tm, d_model), jnp.float32)],  # f32 accumulator
        ),
        compiler_params=pltpu.CompilerParams(
            dimension_semantics=("parallel", "arbitrary"),
            vmem_limit_bytes=48 * 1024 * 1024,  # headroom; safe on v5e/v6e/v7x
        ),
        cost_estimate=cost,
    )(x, w1, b1, w2, b2)

    return out[:M]


if __name__ == "__main__":
    # Small but lane-dense shapes (d_model/d_ff multiples of 128).
    batch, seq, d_model, d_ff = 2, 8, 128, 256
    key = jax.random.PRNGKey(0)
    kx, kw1, kb1, kw2, kb2 = jax.random.split(key, 5)

    x = jax.random.normal(kx, (batch, seq, d_model), dtype=jnp.float32)
    # weights_init_normal -> Gaussian init (std=0.02), stored pre-transposed [in, out]
    w1 = 0.02 * jax.random.normal(kw1, (d_model, d_ff), dtype=jnp.float32)
    b1 = 0.02 * jax.random.normal(kb1, (1, d_ff), dtype=jnp.float32)
    w2 = 0.02 * jax.random.normal(kw2, (d_ff, d_model), dtype=jnp.float32)
    b2 = 0.02 * jax.random.normal(kb2, (1, d_model), dtype=jnp.float32)

    # bf16 storage for activations/weights (MXU-native); biases + accumulation f32.
    x_bf = x.astype(jnp.bfloat16)
    w1_bf = w1.astype(jnp.bfloat16)
    w2_bf = w2.astype(jnp.bfloat16)

    x2d = x_bf.reshape(batch * seq, d_model)
    # tk=128 so the d_ff reduction axis runs 2 steps and exercises accumulation.
    out = positionwise_ffn(x2d, w1_bf, b1, w2_bf, b2, activation="relu", tk=128)
    out = out.reshape(batch, seq, d_model).astype(jnp.float32)
    jax.block_until_ready(out)

    # Reference in plain JAX with the same bf16 inputs / f32 accumulation.
    xr = x_bf.astype(jnp.float32).reshape(batch * seq, d_model)
    h_ref = jnp.maximum(xr @ w1_bf.astype(jnp.float32) + b1, 0.0)
    ref = h_ref.astype(jnp.bfloat16).astype(jnp.float32) @ w2_bf.astype(jnp.float32) + b2
    ref = ref.reshape(batch, seq, d_model)
    assert jnp.allclose(out, ref, atol=5e-2, rtol=5e-2), "mismatch vs reference"

    print("KERNEL_OK")
</pallas_src>

<mosaic_0001>
module attributes {stable_mosaic.version = 11 : i64} {
  func.func @ffn_kernel(%arg0: i32, %arg1: i32, %arg2: memref<16x128xbf16, #tpu.memory_space<vmem>>, %arg3: memref<128x128xbf16, #tpu.memory_space<vmem>>, %arg4: memref<1x128xf32, #tpu.memory_space<vmem>>, %arg5: memref<128x128xbf16, #tpu.memory_space<vmem>>, %arg6: memref<1x128xf32, #tpu.memory_space<vmem>>, %arg7: memref<16x128xbf16, #tpu.memory_space<vmem>>, %arg8: memref<16x128xf32, #tpu.memory_space<vmem>>) attributes {dimension_semantics = [#tpu.dimension_semantics<parallel>, #tpu.dimension_semantics<arbitrary>], iteration_bounds = array<i64: 1, 2>, scalar_prefetch = 0 : i64, scratch_operands = 1 : i64, tpu.core_type = #tpu.core_type<tc>, window_params = [{transform_indices = @transform_0, window_bounds = array<i64: 16, 128>}, {transform_indices = @transform_1, window_bounds = array<i64: 128, 128>}, {transform_indices = @transform_2, window_bounds = array<i64: 1, 128>}, {transform_indices = @transform_3, window_bounds = array<i64: 128, 128>}, {pipeline_mode = #tpu.pipeline_mode<synchronous>, transform_indices = @transform_4, window_bounds = array<i64: 1, 128>}, {transform_indices = @transform_5, window_bounds = array<i64: 16, 128>}]} {
    %c0_i32 = arith.constant 0 : i32
    %0 = arith.cmpi eq, %arg1, %c0_i32 : i32
    %1 = arith.extui %0 : i1 to i32
    %c0_i32_0 = arith.constant 0 : i32
    %2 = arith.cmpi ne, %1, %c0_i32_0 : i32
    scf.if %2 {
      %cst_15 = arith.constant 0.000000e+00 : f32
      %20 = vector.broadcast %cst_15 : f32 to vector<16x128xf32>
      %c0_16 = arith.constant 0 : index
      %c0_17 = arith.constant 0 : index
      %21 = vector.load %arg8[%c0_16, %c0_17] : memref<16x128xf32, #tpu.memory_space<vmem>>, vector<16x128xf32>
      tpu.vector_store %arg8[%c0_16, %c0_17], %20 {strides = array<i32>} : memref<16x128xf32, #tpu.memory_space<vmem>>, vector<16x128xf32>,
    } else {
    }
    %c0 = arith.constant 0 : index
    %c0_1 = arith.constant 0 : index
    %3 = vector.load %arg2[%c0, %c0_1] : memref<16x128xbf16, #tpu.memory_space<vmem>>, vector<16x128xbf16>
    %c0_2 = arith.constant 0 : index
    %c0_3 = arith.constant 0 : index
    %4 = vector.load %arg3[%c0_2, %c0_3] : memref<128x128xbf16, #tpu.memory_space<vmem>>, vector<128x128xbf16>
    %cst = arith.constant dense<0.000000e+00> : vector<16x128xf32>
    %5 = tpu.matmul %3, %4, %cst {dimension_numbers = #tpu.dot_dimension_numbers<[1], [0], [0], [1], [0, 0, 1, 1], [], []>} : vector<16x128xbf16>, vector<128x128xbf16>, vector<16x128xf32> -> vector<16x128xf32>
    %c0_4 = arith.constant 0 : index
    %c0_5 = arith.constant 0 : index
    %6 = vector.load %arg4[%c0_4, %c0_5] : memref<1x128xf32, #tpu.memory_space<vmem>>, vector<1x128xf32>
    %7 = vector.broadcast %6 : vector<1x128xf32> to vector<16x128xf32>
    %8 = arith.addf %5, %7 : vector<16x128xf32>
    %cst_6 = arith.constant 0.000000e+00 : f32
    %9 = vector.broadcast %cst_6 : f32 to vector<16x128xf32>
    %10 = arith.maximumf %8, %9 : vector<16x128xf32>
    %c0_7 = arith.constant 0 : index
    %c0_8 = arith.constant 0 : index
    %11 = vector.load %arg8[%c0_7, %c0_8] : memref<16x128xf32, #tpu.memory_space<vmem>>, vector<16x128xf32>
    %12 = arith.truncf %10 : vector<16x128xf32> to vector<16x128xbf16>
    %c0_9 = arith.constant 0 : index
    %c0_10 = arith.constant 0 : index
    %13 = vector.load %arg5[%c0_9, %c0_10] : memref<128x128xbf16, #tpu.memory_space<vmem>>, vector<128x128xbf16>
    %cst_11 = arith.constant dense<0.000000e+00> : vector<16x128xf32>
    %14 = tpu.matmul %12, %13, %cst_11 {dimension_numbers = #tpu.dot_dimension_numbers<[1], [0], [0], [1], [0, 0, 1, 1], [], []>} : vector<16x128xbf16>, vector<128x128xbf16>, vector<16x128xf32> -> vector<16x128xf32>
    %15 = arith.addf %11, %14 : vector<16x128xf32>
    %c0_12 = arith.constant 0 : index
    %c0_13 = arith.constant 0 : index
    %16 = vector.load %arg8[%c0_12, %c0_13] : memref<16x128xf32, #tpu.memory_space<vmem>>, vector<16x128xf32>
    tpu.vector_store %arg8[%c0_12, %c0_13], %15 {strides = array<i32>} : memref<16x128xf32, #tpu.memory_space<vmem>>, vector<16x128xf32>,
    %c1_i32 = arith.constant 1 : i32
    %17 = arith.cmpi eq, %arg1, %c1_i32 : i32
    %18 = arith.extui %17 : i1 to i32
    %c0_i32_14 = arith.constant 0 : i32
    %19 = arith.cmpi ne, %18, %c0_i32_14 : i32
    scf.if %19 {
      %c0_15 = arith.constant 0 : index
      %c0_16 = arith.constant 0 : index
      %20 = vector.load %arg8[%c0_15, %c0_16] : memref<16x128xf32, #tpu.memory_space<vmem>>, vector<16x128xf32>
      %c0_17 = arith.constant 0 : index
      %c0_18 = arith.constant 0 : index
      %21 = vector.load %arg6[%c0_17, %c0_18] : memref<1x128xf32, #tpu.memory_space<vmem>>, vector<1x128xf32>
      %22 = vector.broadcast %21 : vector<1x128xf32> to vector<16x128xf32>
      %23 = arith.addf %20, %22 : vector<16x128xf32>
      %24 = arith.truncf %23 : vector<16x128xf32> to vector<16x128xbf16>
      %c0_19 = arith.constant 0 : index
      %c0_20 = arith.constant 0 : index
      %25 = vector.load %arg7[%c0_19, %c0_20] : memref<16x128xbf16, #tpu.memory_space<vmem>>, vector<16x128xbf16>
      tpu.vector_store %arg7[%c0_19, %c0_20], %24 {strides = array<i32>} : memref<16x128xbf16, #tpu.memory_space<vmem>>, vector<16x128xbf16>,
    } else {
    }
    return
  }
  func.func @transform_0(%arg0: i32, %arg1: i32) -> (i32, i32) {
    %c0_i32 = arith.constant 0 : i32
    %c0_i32_0 = arith.constant 0 : i32
    return %arg0, %c0_i32 : i32, i32
  }
  func.func @transform_1(%arg0: i32, %arg1: i32) -> (i32, i32) {
    %c0_i32 = arith.constant 0 : i32
    %c0_i32_0 = arith.constant 0 : i32
    return %c0_i32, %arg1 : i32, i32
  }
  func.func @transform_2(%arg0: i32, %arg1: i32) -> (i32, i32) {
    %c0_i32 = arith.constant 0 : i32
    %c0_i32_0 = arith.constant 0 : i32
    return %c0_i32, %arg1 : i32, i32
  }
  func.func @transform_3(%arg0: i32, %arg1: i32) -> (i32, i32) {
    %c0_i32 = arith.constant 0 : i32
    %c0_i32_0 = arith.constant 0 : i32
    return %arg1, %c0_i32 : i32, i32
  }
  func.func @transform_4(%arg0: i32, %arg1: i32) -> (i32, i32) {
    %c0_i32 = arith.constant 0 : i32
    %c0_i32_0 = arith.constant 0 : i32
    %c0_i32_1 = arith.constant 0 : i32
    return %c0_i32, %c0_i32_0 : i32, i32
  }
  func.func @transform_5(%arg0: i32, %arg1: i32) -> (i32, i32) {
    %c0_i32 = arith.constant 0 : i32
    %c0_i32_0 = arith.constant 0 : i32
    return %arg0, %c0_i32 : i32, i32
  }
}

</mosaic_0001>

<bundles_post_ra>
// kernel: tpu_custom_call.1
= control target key start
LH: loop header
LB: loop body
LE: loop exit
PB: predicated region body
PF: predicated region fallthrough
CT: control target
= control target key end

     0   :  { %10 = vsyncpa [#allocation4], 0  ;;  %s1406_s0 = inlined_call_operand.hbm [shape: bf16[16,128], index: 0, kind: input, shape index: {}]   ;;  %s1407_s1 = inlined_call_operand.hbm [shape: bf16[128,256], index: 1, kind: input, shape index: {}]   ;;  %s1408_s2 = inlined_call_operand.vmem [shape: f32[1,256], index: 2, kind: input, shape index: {}]   ;;  %s1409_s3 = inlined_call_operand.hbm [shape: bf16[256,128], index: 3, kind: input, shape index: {}]   ;;  %s1410_s4 = inlined_call_operand.vmem [shape: f32[1,128], index: 4, kind: input, shape index: {}]   ;;  %s1411_s5 = inlined_call_operand.hbm [shape: bf16[16,128], index: 5, kind: output, shape index: {}]  }
   0x1   :  { %11 = vsyncpa [#allocation7], 0 }
   0x2   :  { %13 = vsyncpa [#allocation7 + $0x1], 0 }
   0x3   :  { %14 = vsyncpa [#allocation5], 0  ;;  %s1131_s18 = smov 0   ;;  %s1133_s19 = smov 0  }
   0x4   :  { %s1135_s20 = smov 0   ;;  %s1137_s21 = smov 0  }
   0x5   :  { %s1139_s22 = smov 0   ;;  %s1141_s23 = smov 0  }
   0x6 LB: > { %s29_s24 = sadd.s32 1, %s1083_s22  ;;  %s65_s25 = sadd.s32 1, %s1075_s20  ;;  %s1087_s23 = sphi %s1141_s23, %s20_s23   ;;  %s1083_s22 = sphi %s1139_s22, %s1428_s22   ;;  %s1079_s21 = sphi %s1137_s21, %s1427_s21   ;;  %s1075_s20 = sphi %s1135_s20, %s1426_s20   ;;  %s1071_s19 = sphi %s1133_s19, %s1425_s19   ;;  %s1067_s18 = sphi %s1131_s18, %s1424_s18  }
   0x7   : > { %p30_p0 = scmp.ge.s32.totalorder %s29_s24, 2  ;;  %p72_p1 = scmp.ne.s32.totalorder %s1075_s20, %s1071_s19 }
   0x8   : > { %p73_p2 = scmp.eq.s32.totalorder %s1087_s23, 0  ;;  %p836_p5 = scmp.lt.s32.totalorder %s1087_s23, 2 }
   0x9   : > { %s1430_s24 = smov (%p30_p0, %s29_s24), 0  ;;  %s220_s28 = sand.u32 1, %s1087_s23  }
   0xa   : > { %p1168_p3 = por %p73_p2, %p72_p1  ;;  %s62_s27 = ssub.s32 %s1083_s22, %s1430_s24 }
   0xb   : > { %p63_p4 = scmp.eq.s32.totalorder %s62_s27, 0  ;;  %s222_s29 = sand.u32 1, %s1075_s20  }
   0xc   : > { %s1180_s6 = sshll.u32 %s222_s29, 6  ;;  %s711_s7 = sshll.u32 %s1083_s22, 6 }
   0xd   : > { %s1178_s30 = scalar_select %p63_p4, %s1075_s20, %s65_s25  }
   0xe   : > { %s1186_s10 = scalar_lea.hbm %s1407_s1, %s711_s7  ;;  %s224_s11 = scalar_lea.vmem [#allocation6], %s1180_s6 }
   0xf   : > { %s230_s12 = sshll.u32 %s224_s11, 4  ;;  %p1193_p6 = pnand %p836_p5, %p1168_p3  ;;  %s1189_s12 = int_to_ptr.vmem [resolvable:$true] %s230_s12 }
  0x10   : > { %s1197_s14 = scalar_lea.sflag [#allocation7], %s220_s28  ;;  %s915_s15 = scalar_lea.hbm %s1186_s10, 1024 }
  0x11   : > { %p916_p7 = scmp.ne.s32.totalorder %s1186_s10, %s915_s15  ;;  %p917_p8 = pneg %p1193_p6 }
  0x12   : > { %s920_s25 = scalar_lea.hbm %s1407_s1, 2048  ;;  %p921_p11 = scmp.lt.u32.totalorder %s1186_s10, %s1407_s1 }
  0x13   : > { %p918_p9 = pnand %p917_p8, %p916_p7  ;;  %p922_p12 = scmp.lt.u32.totalorder %s920_s25, %s915_s15 }
  0x14   : > { %p924_p0 = scmp.lt.u32.totalorder %s915_s15, %s1186_s10 }
  0x15   : > { %p919_p10 = pneg %p918_p9  ;;  %p923_p13 = por %p922_p12, %p921_p11 }
  0x17   : > { %p925_p1 = por %p924_p0, %p923_p13 }
  0x19   : > { %p926_p2 = pnand %p925_p1, %p919_p10 }
  0x1b   : > { %929 = shalt.err (!%p926_p2)
}
  0x1c   : > { %s930_s28 = scalar_lea.vmem %s1189_s12, 1024  ;;  %s1089_s29 = smov [#allocation6]  }
  0x1d   : > { %p931_p3 = scmp.ne.s32.totalorder %s1189_s12, %s930_s28  ;;  %s935_s7 = sshll.u32 %s1089_s29, 4  ;;  %s936_s7 = int_to_ptr.vmem [resolvable:$false] %s935_s7 }
  0x1e   : > { %s937_s8 = scalar_lea.vmem %s936_s7, 2048  ;;  %p938_p7 = scmp.lt.s32.totalorder %s1189_s12, %s936_s7 }
  0x1f   : > { %p933_p4 = pnand %p931_p3, %p917_p8  ;;  %p939_p9 = scmp.lt.s32.totalorder %s937_s8, %s930_s28 }
  0x21   : > { %p934_p5 = pneg %p933_p4  ;;  %p940_p11 = por %p939_p9, %p938_p7 }
  0x23   : > { %p941_p12 = pnand %p940_p11, %p934_p5 }
  0x25   : > { %944 = shalt.err (!%p941_p12)
}
  0x26   : > { %s1090_s9 = smov 128   ;;  %s1091_s11 = smov 64  }
  0x27   : > { %s1092_s15 = smov 4   ;;  %s1228_s16 = sadd.s32 4294967295, %s1087_s23  }
  0x28   : > { %831 = dma.hbm_to_vmem [thread:$0]  (!%p1193_p6), %s1186_s10, 1024, %s1189_s12, %s1197_s14, %s1090_s9, %s1091_s11, %s1092_s15  }
  0x29   : > { %p78_p10 = scmp.ne.s32.totalorder %s1071_s19, %s1067_s18  ;;  %p1412_p13 = scmp.eq.s32.totalorder %s1228_s16, 0 }
  0x2a   : > { %p707_p0 = scmp.ge.s32.totalorder %s1087_s23, 1  ;;  %p188_p1 = scmp.lt.s32.totalorder %s1087_s23, 3 }
  0x2b   : > { %p1237_p2 = por %p1412_p13, %p78_p10  ;;  %s1093_s10 = smov [#allocation3]  }
  0x2c   : > { %p1241_p3 = pnand %p707_p0, %p188_p1  ;;  %s203_s12 = sshll.u32 %s1093_s10, 4  ;;  %s1245_s12 = int_to_ptr.vmem [resolvable:$true] %s203_s12 }
  0x2d   : > { %s1417_s17 = scalar_select %p1237_p2, 1, 0 }
  0x2e   : > { %s1418_s25 = scalar_select %p1241_p3, 1, 0 }
  0x2f   : > { %p824_p4 = pneg %p1241_p3  ;;  %s746_s18 = sshll.u32 %s1083_s22, 10 }
  0x30   : > { %s1253_s28 = scalar_lea.hbm %s1409_s3, %s746_s18  ;;  %s250_s29 = scalar_lea.vmem [#allocation8], %s1180_s6 }
  0x31   : > { %s257_s7 = sshll.u32 %s250_s29, 4  ;;  %p1258_p5 = pnand %p824_p4, %p1412_p13  ;;  %s1262_s7 = int_to_ptr.vmem [resolvable:$true] %s257_s7 }
  0x32   : > { %s945_s9 = scalar_lea.hbm %s1253_s28, 1024  ;;  %s950_s26 = scalar_lea.hbm %s1409_s3, 2048 }
  0x33   : > { %p946_p7 = scmp.ne.s32.totalorder %s1253_s28, %s945_s9  ;;  %p951_p12 = scmp.lt.u32.totalorder %s1253_s28, %s1409_s3 }
  0x34   : > { %p952_p10 = scmp.lt.u32.totalorder %s950_s26, %s945_s9  ;;  %p954_p1 = scmp.lt.u32.totalorder %s945_s9, %s1253_s28 }
  0x35   : > { %p948_p9 = pnand %p946_p7, %p917_p8 }
  0x36   : > { %p953_p0 = por %p952_p10, %p951_p12 }
  0x37   : > { %p949_p11 = pneg %p948_p9 }
  0x38   : > { %p955_p4 = por %p954_p1, %p953_p0 }
  0x3a   : > { %p956_p13 = pnand %p955_p4, %p949_p11 }
  0x3c   : > { %959 = shalt.err (!%p956_p13)
}
  0x3d   : > { %s960_s29 = scalar_lea.vmem %s1262_s7, 1024  ;;  %s1094_s10 = smov [#allocation8]  }
  0x3e   : > { %p961_p7 = scmp.ne.s32.totalorder %s1262_s7, %s960_s29  ;;  %s965_s18 = sshll.u32 %s1094_s10, 4  ;;  %s966_s18 = int_to_ptr.vmem [resolvable:$false] %s965_s18 }
  0x3f   : > { %s967_s27 = scalar_lea.vmem %s966_s18, 2048  ;;  %p968_p3 = scmp.lt.s32.totalorder %s1262_s7, %s966_s18 }
  0x40   : > { %p963_p9 = pnand %p961_p7, %p917_p8  ;;  %p969_p12 = scmp.lt.s32.totalorder %s967_s27, %s960_s29 }
  0x42   : > { %p964_p2 = pneg %p963_p9  ;;  %p970_p10 = por %p969_p12, %p968_p3 }
  0x44   : > { %p971_p0 = pnand %p970_p10, %p964_p2 }
  0x46   : > { %974 = shalt.err (!%p971_p0)
}
  0x47   : > { %834 = dma.hbm_to_vmem [thread:$0]  (!%p1193_p6), %s1253_s28, 1024, %s1262_s7, %s1197_s14, %s1091_s11, %s1091_s11, %s1092_s15  }
  0x48   : > { %s975_s6 = scalar_lea.hbm %s1406_s0, 128  ;;  %p977_p13 = pneg %p1258_p5 }
  0x49   : > { %p976_p8 = scmp.ne.s32.totalorder %s1406_s0, %s975_s6  ;;  %p982_p11 = scmp.lt.u32.totalorder %s975_s6, %s1406_s0 }
  0x4b   : > { %p978_p2 = pnand %p977_p13, %p976_p8 }
  0x4d   : > { %p979_p3 = pneg %p978_p2 }
  0x4f   : > { %p984_p1 = pnand %p982_p11, %p979_p3 }
  0x51   : > { %987 = shalt.err (!%p984_p1)
}
  0x52   : > { %s988_s14 = scalar_lea.vmem %s1245_s12, 128  ;;  %p996_p9 = scmp.lt.s32.totalorder %s1245_s12, %s1245_s12 }
  0x53   : > { %p989_p6 = scmp.ne.s32.totalorder %s1245_s12, %s988_s14  ;;  %p997_p12 = scmp.lt.s32.totalorder %s988_s14, %s988_s14 }
  0x55   : > { %p991_p4 = pnand %p989_p6, %p977_p13  ;;  %p998_p10 = por %p997_p12, %p996_p9 }
  0x57   : > { %p992_p7 = pneg %p991_p4 }
  0x59   : > { %p999_p0 = pnand %p998_p10, %p992_p7 }
  0x5b   : > { %1002 = shalt.err (!%p999_p0)
}
  0x5c   : > { %827 = dma.hbm_to_vmem [thread:$0]  (!%p1258_p5), %s1406_s0, 128, %s1245_s12, [#allocation4], %s1091_s11, %s1091_s11, %s1092_s15  }
  0x5d   : > { %p1420_p8 = scmp.ne.s32.totalorder %s1418_s25, 0 }
  0x5e   : > { %p1421_p13 = scmp.eq.s32.totalorder (!%p1420_p8), %s1228_s16, 0 }
  0x5f   : > { %269 = sbr.rel (%p1420_p8) target bundleno = 626 (0x272), region = 40 }
  0x66   : > { %1054 = dma.done.wait (%p1421_p13), [#allocation4], 128   ;;  %p1422_p2 = pmov %p1421_p13 }
  0x67   : > { %s275_s8 = sand.u32 1, %s1228_s16   ;;  %s277_s27 = sand.u32 1, %s1071_s19  }
  0x68   : > { %1056 = vsyncadd (%p1422_p2), [#allocation4], 4294967168  ;;  %s717_s9 = sshll.u32 %s277_s27, 6  ;;  %s276_s26 = scalar_lea.sflag [#allocation7], %s275_s8 }
  0x69   : > { %s1323_s6 = scalar_lea.vmem [#allocation6], %s717_s9  ;;  %p1423_p3 = scmp.ne.s32.totalorder %s1417_s17, 0 }
  0x6b   : > { %1058 = dma.done.wait (%p1423_p3), %s276_s26, 2048  }
  0x6c   : > { %1060 = vsyncadd (%p1423_p3), %s276_s26, 4294965248  ;;  %p319_p5 = scmp.lt.s32.totalorder %s1079_s21, 1  ;;  %s1337_s10 = scalar_lea.vmem [#allocation8], %s717_s9 }
  0x6d   : > { %p719_p11 = scmp.ne.s32.totalorder %s1079_s21, 0 }
  0x6e   : > { %s1331_s11 = scalar_select %p319_p5, %s1079_s21, 1 }
  0x6f   : > { %328 = sbr.rel (%p719_p11) target bundleno = 118 (0x76), region = 56  ;;  %v1095_v0 = vmov (!%p719_p11), 0.0  }
  0x70   : > { %s321_s12 = scalar_lea.vmem %s1408_s2, %s1331_s11  ;;  %329 = vst [vmem:[#allocation2] sm:$0xff] (!%p719_p11), %v1095_v0  ;;  %330 = vst [vmem:[#allocation2 + $0x8] sm:$0xff] (!%p719_p11), %v1095_v0 }
  0x76 PF: > { %v898_v1 = vld [vmem:[%s1323_s6] sm:$0xff]   ;;  %v1096_v2 = vmov 0.0   ;;  %v899_v3 = vld [vmem:[%s1323_s6 + $0x8] sm:$0xff]   ;;  %vm1097_vm0 = vmmov 0   ;;  %v900_v4 = vld [vmem:[%s1323_s6 + $0x10] sm:$0xff]   ;;  %p738_p1 = scmp.ne.s32.totalorder %s1079_s21, 1 }
  0x77   : > { %772 = vmatprep.subr.bf16.mxu0 %v1096_v2  ;;  %792 = vmatprep.subr.bf16.mxu1 %v1096_v2  ;;  %v907_v5 = vld [vmem:[%s1337_s10] sm:$0xff]   ;;  %v901_v6 = vld [vmem:[%s1323_s6 + $0x18] sm:$0xff]   ;;  %v908_v7 = vld [vmem:[%s1337_s10 + $0x8] sm:$0xff]  }
  0x78   : > { %773 = vmatpush3.bf16.msra.mxu0 %v898_v1  ;;  %788 = vmatprep.mubr.msk.bf16.mxu0 %vm1097_vm0, %v1096_v2  ;;  %v902_v8 = vld [vmem:[%s1323_s6 + $0x20] sm:$0xff]   ;;  %v909_v9 = vld [vmem:[%s1337_s10 + $0x10] sm:$0xff]   ;;  %v903_v10 = vld [vmem:[%s1323_s6 + $0x28] sm:$0xff]  }
  0x79   : > { %774 = vmatprep.subr.bf16.mxu0 %v1096_v2  ;;  %808 = vmatprep.mubr.msk.bf16.mxu1 %vm1097_vm0, %v1096_v2  ;;  %v910_v11 = vld [vmem:[%s1337_s10 + $0x18] sm:$0xff]   ;;  %v904_v12 = vld [vmem:[%s1323_s6 + $0x30] sm:$0xff]   ;;  %v911_v13 = vld [vmem:[%s1337_s10 + $0x20] sm:$0xff]  }
  0x7a   : > { %793 = vmatpush3.bf16.msra.mxu1 %v907_v5  ;;  %v905_v14 = vld [vmem:[%s1323_s6 + $0x38] sm:$0xff]   ;;  %v912_v15 = vld [vmem:[%s1337_s10 + $0x28] sm:$0xff]   ;;  %v913_v17 = vld [vmem:[%s1337_s10 + $0x30] sm:$0xff]  }
  0x7b   : > { %794 = vmatprep.subr.bf16.mxu1 %v1096_v2  ;;  %v906_v16 = vld [vmem:[#allocation3] sm:$0xff]   ;;  %v720_v19 = vld [vmem:[%s321_s12] ss:$0 sm:$0xff]  ;;  %v454_v31 = vld [vmem:[#allocation2 + $0x8] sm:$0xff] }
  0x7c   : > { %775 = vmatpush3.bf16.msra.mxu0 %v899_v3  ;;  %v914_v18 = vld [vmem:[%s1337_s10 + $0x38] sm:$0xff]   ;;  %v453_v29 = vld [vmem:[#allocation2] sm:$0xff] }
  0x7d   : > { %776 = vmatprep.subr.bf16.mxu0 %v1096_v2  ;;  %v739_v39 = vld [vmem:[%s1410_s4] ss:$0 sm:$0xff] (!%p738_p1) }
  0x7e   : > { %795 = vmatpush3.bf16.msra.mxu1 %v908_v7 }
  0x7f   : > { %796 = vmatprep.subr.bf16.mxu1 %v1096_v2 }
  0x80   : > { %777 = vmatpush3.bf16.msra.mxu0 %v900_v4 }
  0x81   : > { %778 = vmatprep.subr.bf16.mxu0 %v1096_v2 }
  0x82   : > { %797 = vmatpush3.bf16.msra.mxu1 %v909_v9 }
  0x83   : > { %798 = vmatprep.subr.bf16.mxu1 %v1096_v2 }
  0x84   : > { %779 = vmatpush3.bf16.msra.mxu0 %v901_v6 }
  0x85   : > { %780 = vmatprep.subr.bf16.mxu0 %v1096_v2 }
  0x86   : > { %799 = vmatpush3.bf16.msra.mxu1 %v910_v11 }
  0x87   : > { %800 = vmatprep.subr.bf16.mxu1 %v1096_v2 }
  0x88   : > { %781 = vmatpush3.bf16.msra.mxu0 %v902_v8 }
  0x89   : > { %782 = vmatprep.subr.bf16.mxu0 %v1096_v2 }
  0x8a   : > { %801 = vmatpush3.bf16.msra.mxu1 %v911_v13 }
  0x8b   : > { %802 = vmatprep.subr.bf16.mxu1 %v1096_v2 }
  0x8c   : > { %783 = vmatpush3.bf16.msra.mxu0 %v903_v10 }
  0x8d   : > { %784 = vmatprep.subr.bf16.mxu0 %v1096_v2 }
  0x8e   : > { %803 = vmatpush3.bf16.msra.mxu1 %v912_v15 }
  0x8f   : > { %804 = vmatprep.subr.bf16.mxu1 %v1096_v2 }
  0x90   : > { %785 = vmatpush3.bf16.msra.mxu0 %v904_v12 }
  0x91   : > { %786 = vmatprep.subr.bf16.mxu0 %v1096_v2 }
  0x92   : > { %805 = vmatpush3.bf16.msra.mxu1 %v913_v17 }
  0x93   : > { %806 = vmatprep.subr.bf16.mxu1 %v1096_v2 }
  0x94   : > { %787 = vmatpush3.bf16.msra.mxu0 %v905_v14 }
  0x96   : > { %807 = vmatpush3.bf16.msra.mxu1 %v914_v18 }
  0x97   : > { %789 = vmatmul.mubr.bf16.vlgmr.msra.gmra.mrb[0].mxu0 %v906_v16 }
 0x16a   : > { %v444_v20 = vpop.f32.mrb[0].mxu0 }
 0x16b   : > { %v445_v21 = vadd.f32 %v720_v19, %v444_v20  ;;  %v790_v22 = vpop.f32.mrb[1].mxu0 }
 0x16c   : > { %v447_v23 = vpop.f32.mrb[2].mxu0 }
 0x16d   : > { %v448_v24 = vadd.f32 %v720_v19, %v447_v23  ;;  %v791_v25 = vpop.f32.mrb[3].mxu0  ;;  %v451_v26 = vmax.f32 %v445_v21, 0.0 }
 0x16f   : > { %v452_v27 = vmax.f32 %v448_v24, 0.0 }
 0x171   : > { %v455_v28 = vpack.c.bf16 %v452_v27, %v451_v26 }
 0x173   : > { %809 = vmatmul.mubr.bf16.vlgmr.msra.gmra.mrb[0].mxu1 %v455_v28 }
 0x245   : > { %568 = sbr.rel (%p738_p1) target bundleno = 600 (0x258), region = 60 }
 0x246   : > { %v554_v30 = vpop.f32.mrb[0].mxu1 }
 0x247   : > { %v561_v32 = vadd.f32 %v554_v30, %v453_v29  ;;  %v810_v33 = vpop.f32.mrb[1].mxu1 }
 0x248   : > { %v557_v34 = vpop.f32.mrb[2].mxu1 }
 0x249   : > { %563 = vst [vmem:[#allocation2] sm:$0xff] %v561_v32  ;;  %v562_v35 = vadd.f32 %v557_v34, %v454_v31  ;;  %v811_v36 = vpop.f32.mrb[3].mxu1 }
 0x24b   : > { %564 = vst [vmem:[#allocation2 + $0x8] sm:$0xff] %v562_v35 }
 0x250   : > { %v569_v37 = vld [vmem:[#allocation2] sm:$0xff] }
 0x251   : > { %v578_v40 = vadd.f32 %v739_v39, %v569_v37 }
 0x252   : > { %v570_v38 = vld [vmem:[#allocation2 + $0x8] sm:$0xff] }
 0x253   : > { %v579_v41 = vadd.f32 %v739_v39, %v570_v38 }
 0x255   : > { %v752_v42 = vpack.c.bf16 %v579_v41, %v578_v40 }
 0x257   : > { %753 = vst [vmem:[#allocation9] sm:$0xff] %v752_v42  }
 0x258 PF: > { %p838_p6 = scmp.eq.s32.totalorder %s1228_s16, 1  ;;  %s1098_s14 = smov [#allocation9]  }
 0x259   : > { %s599_s28 = sshll.u32 %s1098_s14, 4  ;;  %s600_s28 = int_to_ptr.vmem [resolvable:$true] %s599_s28 }
 0x25a   : > { %s1003_s7 = scalar_lea.vmem %s600_s28, 128  ;;  %p1010_p12 = scmp.lt.s32.totalorder %s600_s28, %s600_s28 }
 0x25b   : > { %p1004_p4 = scmp.ne.s32.totalorder %s600_s28, %s1003_s7  ;;  %p1011_p10 = scmp.lt.s32.totalorder %s1003_s7, %s1003_s7 }
 0x25d   : > { %p1005_p7 = pnand %p1004_p4, %p838_p6  ;;  %p1012_p0 = por %p1011_p10, %p1010_p12 }
 0x25f   : > { %p1006_p9 = pneg %p1005_p7 }
 0x261   : > { %p1013_p8 = pnand %p1012_p0, %p1006_p9 }
 0x263   : > { %1016 = shalt.err (!%p1013_p8)
}
 0x264   : > { %s1017_s27 = scalar_lea.hbm %s1411_s5, 128 }
 0x265   : > { %p1018_p13 = scmp.ne.s32.totalorder %s1411_s5, %s1017_s27  ;;  %p1023_p5 = scmp.lt.u32.totalorder %s1017_s27, %s1411_s5 }
 0x267   : > { %p1019_p2 = pnand %p1018_p13, %p838_p6 }
 0x269   : > { %p1020_p3 = pneg %p1019_p2 }
 0x26b   : > { %p1025_p11 = pnand %p1023_p5, %p1020_p3 }
 0x26d   : > { %1028 = shalt.err (!%p1025_p11)
}
 0x26e   : > { %s1099_s15 = smov 64   ;;  %s1100_s25 = smov 4  }
 0x26f   : > { %821 = dma.vmem_to_hbm [thread:$0]  (%p838_p6), %s600_s28, 128, %s1411_s5, [#allocation5], %s1099_s15, %s1099_s15, %s1100_s25  }
 0x270   : > { %1062 = dma.done.wait (%p838_p6), [#allocation5], 128  }
 0x271   : > { %1064 = vsyncadd (%p838_p6), [#allocation5], 4294967168 }
 0x272 PF: > { %s20_s23 = sadd.s32 1, %s1087_s23   ;;  %s1424_s18 = smov %s1071_s19 }
 0x273   : > { %p17_p1 = scmp.ge.s32.totalorder %s20_s23, 4   ;;  %s1425_s19 = smov %s1075_s20 }
 0x274   : > { %s1426_s20 = smov %s1178_s30  ;;  %s1427_s21 = smov %s1083_s22 }
 0x275   : > { %s1428_s22 = smov %s1430_s24  ;;  %19 = sbr.rel (!%p17_p1) target bundleno = 6 (0x6), region = 106 }
 0x27c   :  { %615 = vsyncpa [#allocation4], 1 }
 0x27d   :  { %617 = vsyncpa [#allocation4 + $0x1], 1 }
 0x27e   :  { %618 = vsyncpa [#allocation7], 1 }
 0x27f   :  { %620 = vsyncpa [#allocation7 + $0x1], 1 }
 0x280   :  { %621 = vsyncpa [#allocation5], 1 }
 0x281   :  { %623 = vsyncpa [#allocation5 + $0x1], 1 }

</bundles_post_ra>
